<compile_context>
chip_gen: v7x
topology: tpu7x:2x2x1
jax: 0.10.0
libtpu: 0.0.40
codegen_flags: <defaults>
</compile_context>

<pallas_src>
import functools

import jax
import jax.numpy as jnp
from jax import lax
from jax.experimental import pallas as pl
from jax.experimental.pallas import tpu as pltpu


def _round_up(n, m):
    return -(-n // m) * m


def _device_defaults():
    """(block_m, block_v, vmem_limit_bytes, want_vocab_split) per TPU gen."""
    kind = ""
    try:
        kind = jax.devices()[0].device_kind.lower()
    except Exception:
        pass
    # v7x: 2 TCs but only 64 MiB VMEM per TC; tm=512 is already past the
    # ~300-350 FLOP/byte crossover (3.2 TB/s HBM) so bigger tiles buy nothing.
    if "tpu7" in kind or "v7" in kind:
        return 512, 512, 48 * 1024 * 1024, True
    # v6e (Trillium): 128 MiB VMEM, crossover ~700 FLOP/byte -> big row tiles.
    if "v6" in kind or "trillium" in kind:
        return 1024, 512, 104 * 1024 * 1024, False
    # v5e: crossover ~240 FLOP/byte; tm=512 saturates the MXU, keep VMEM modest.
    if "v5 lite" in kind or "v5e" in kind or "v5lite" in kind:
        return 512, 512, 96 * 1024 * 1024, False
    # Unknown generation: conservative, previously-validated settings.
    return 512, 512, 64 * 1024 * 1024, False


def _causal_lm_head_kernel(x_ref, g_ref, beta_ref, w_ref, b_ref, o_ref,
                           xn_ref, *, eps):
    """One (tm, tv) tile of float32 logits.

    x_ref:    (tm, E)  input rows (same block across the whole vocab sweep)
    g_ref:    (1, E)   LayerNorm weight
    beta_ref: (1, E)   LayerNorm bias
    w_ref:    (tv, E)  Linear weight tile (native PyTorch layout)
    b_ref:    (1, tv)  Linear bias tile
    o_ref:    (tm, tv) float32 logits tile
    xn_ref:   (tm, E)  VMEM scratch: LayerNorm'd rows in the input dtype,
                       recomputed at the start of each inner vocab sweep and
                       reused for every vocab tile of that sweep.
    """
    @pl.when(pl.program_id(2) == 0)
    def _():
        x = x_ref[...].astype(jnp.float32)
        mu = jnp.mean(x, axis=-1, keepdims=True)
        xc = x - mu
        var = jnp.mean(xc * xc, axis=-1, keepdims=True)
        inv = lax.rsqrt(var + eps)                        # EUP slot, ~free
        xn = xc * inv * g_ref[...].astype(jnp.float32) \
             + beta_ref[...].astype(jnp.float32)
        xn_ref[...] = xn.astype(xn_ref.dtype)             # MXU runs in input dtype

    # (tm, E) . (tv, E)^T -> (tm, tv), f32 accumulation on the MXU.  Both
    # contraction dims are minor (q @ k^T pattern) -> no weight transpose.
    acc = lax.dot_general(
        xn_ref[...], w_ref[...],
        dimension_numbers=(((1,), (1,)), ((), ())),
        preferred_element_type=jnp.float32)
    o_ref[...] = acc + b_ref[...].astype(jnp.float32)


def causal_lm_head(hidden_states, ln_weight, ln_bias, lin_weight, lin_bias,
                   *, eps=1e-5, block_m=None, block_v=None,
                   vmem_limit_bytes=None, vocab_splits=None):
    """float32 logits = Linear(LayerNorm(hidden_states)).

    hidden_states: (..., E); ln_weight/ln_bias: (E,);
    lin_weight: (V, E) (native PyTorch Linear layout); lin_bias: (V,).
    """
    *lead, E = hidden_states.shape
    V = lin_weight.shape[0]
    M = 1
    for d in lead:
        M *= d

    d_bm, d_bv, d_vmem, d_split = _device_defaults()
    block_m = d_bm if block_m is None else block_m          # multiple of 8
    block_v = d_bv if block_v is None else block_v          # multiple of 128
    vmem_limit_bytes = d_vmem if vmem_limit_bytes is None else vmem_limit_bytes

    x = hidden_states.reshape(M, E)                          # free reshape

    # Row tile: 8-aligned; whole M in one tile if it fits.  Only the (cheap)
    # activation rows are ever padded — never the (V, E) weight.
    tm = min(block_m, _round_up(M, 8))
    m_blocks = pl.cdiv(M, tm)
    Mp = m_blocks * tm
    if Mp != M:
        x = jnp.pad(x, ((0, Mp - M), (0, 0)))                # zero rows, finite math

    # Vocab tile: lane-dense (multiple of 128) unless the whole vocab fits one
    # tile.  Ragged last tile handled by Pallas partial blocks (masked stores).
    tv = V if V <= block_v else block_v
    v_blocks = pl.cdiv(V, tv)

    # Vocab-axis parallel split: keeps the second TensorCore busy (v7x) when
    # there is only one row block (decode-shaped M).
    if vocab_splits is None:
        vocab_splits = 2 if (d_split and m_blocks < 2) else 1
    n_vs = vocab_splits if (vocab_splits > 1 and v_blocks % vocab_splits == 0) else 1
    nv_inner = v_blocks // n_vs

    gamma = ln_weight.reshape(1, E)
    beta = ln_bias.reshape(1, E)
    b2d = lin_bias.reshape(1, V)

    def vblk(vs, vi):
        return vs * nv_inner + vi

    kernel = functools.partial(_causal_lm_head_kernel, eps=float(eps))

    out = pl.pallas_call(
        kernel,
        out_shape=jax.ShapeDtypeStruct((M, V), jnp.float32),
        grid_spec=pltpu.PrefetchScalarGridSpec(
            num_scalar_prefetch=0,
            grid=(m_blocks, n_vs, nv_inner),
            in_specs=[
                pl.BlockSpec((tm, E), lambda m, vs, vi: (m, 0)),          # rows
                pl.BlockSpec((1, E), lambda m, vs, vi: (0, 0)),           # LN gamma
                pl.BlockSpec((1, E), lambda m, vs, vi: (0, 0)),           # LN beta
                pl.BlockSpec((tv, E), lambda m, vs, vi: (vblk(vs, vi), 0)),   # W tile
                pl.BlockSpec((1, tv), lambda m, vs, vi: (0, vblk(vs, vi))),   # bias tile
            ],
            out_specs=pl.BlockSpec((tm, tv),
                                   lambda m, vs, vi: (m, vblk(vs, vi))),
            scratch_shapes=[pltpu.VMEM((tm, E), hidden_states.dtype)],
        ),
        compiler_params=pltpu.CompilerParams(
            # row blocks and vocab halves are independent -> parallel
            # (megacore / 2 TCs on v7x); inner vocab axis must stay sequential
            # so the LN scratch written at vi == 0 remains valid per core.
            dimension_semantics=("parallel", "parallel", "arbitrary"),
            vmem_limit_bytes=int(vmem_limit_bytes),
        ),
    )(x, gamma, beta, lin_weight, b2d)

    return out.reshape(*lead, V)


def _reference(x, ln_w, ln_b, lin_w, lin_b, eps):
    xf = x.astype(jnp.float32)
    mu = jnp.mean(xf, axis=-1, keepdims=True)
    var = jnp.mean(jnp.square(xf - mu), axis=-1, keepdims=True)
    xn = (xf - mu) * lax.rsqrt(var + eps) * ln_w.astype(jnp.float32) \
         + ln_b.astype(jnp.float32)
    xn = xn.astype(x.dtype).astype(jnp.float32)
    logits = jnp.einsum('...e,ve->...v', xn, lin_w.astype(jnp.float32),
                        precision=lax.Precision.HIGHEST)
    return logits + lin_b.astype(jnp.float32)


if __name__ == "__main__":
    key = jax.random.PRNGKey(0)
    k1, k2, k3, k4, k5 = jax.random.split(key, 5)
    eps = 1e-5

    # --- config 1: tiling + forced vocab-split path (grid = (2, 2, 1)) ---
    B, S, E, V = 2, 8, 32, 512
    x = jax.random.normal(k1, (B, S, E), dtype=jnp.float32)
    ln_w = 1.0 + 0.1 * jax.random.normal(k2, (E,), dtype=jnp.float32)
    ln_b = 0.1 * jax.random.normal(k3, (E,), dtype=jnp.float32)
    lin_w = jax.random.normal(k4, (V, E), dtype=jnp.float32) / jnp.sqrt(E)
    lin_b = 0.1 * jax.random.normal(k5, (V,), dtype=jnp.float32)

    out = jax.block_until_ready(
        causal_lm_head(x, ln_w, ln_b, lin_w, lin_b, eps=eps,
                       block_m=8, block_v=256, vocab_splits=2))
    ref = _reference(x, ln_w, ln_b, lin_w, lin_b, eps)
    assert out.shape == (B, S, V) and out.dtype == jnp.float32
    assert jnp.allclose(out, ref, atol=1e-3, rtol=1e-3), "mismatch (split/tiled)"

    # --- config 2: non-divisible rows and ragged last vocab tile (no weight pad) ---
    B2, S2, E2, V2 = 2, 5, 32, 300
    x2 = jax.random.normal(k1, (B2, S2, E2), dtype=jnp.float32)
    lin_w2 = jax.random.normal(k4, (V2, E2), dtype=jnp.float32) / jnp.sqrt(E2)
    lin_b2 = 0.1 * jax.random.normal(k5, (V2,), dtype=jnp.float32)
    out2 = jax.block_until_ready(
        causal_lm_head(x2, ln_w, ln_b, lin_w2, lin_b2, eps=eps,
                       block_m=8, block_v=256))
    ref2 = _reference(x2, ln_w, ln_b, lin_w2, lin_b2, eps)
    assert out2.shape == (B2, S2, V2) and out2.dtype == jnp.float32
    assert jnp.allclose(out2, ref2, atol=1e-3, rtol=1e-3), "mismatch (ragged)"

    # --- config 3: device-default tiles / VMEM limit (whole arrays in one block) ---
    V3 = 384
    lin_w3 = jax.random.normal(k4, (V3, E), dtype=jnp.float32) / jnp.sqrt(E)
    lin_b3 = 0.1 * jax.random.normal(k5, (V3,), dtype=jnp.float32)
    out3 = jax.block_until_ready(
        causal_lm_head(x, ln_w, ln_b, lin_w3, lin_b3, eps=eps))
    ref3 = _reference(x, ln_w, ln_b, lin_w3, lin_b3, eps)
    assert out3.shape == (B, S, V3) and out3.dtype == jnp.float32
    assert jnp.allclose(out3, ref3, atol=1e-3, rtol=1e-3), "mismatch (defaults)"

    print("KERNEL_OK")
</pallas_src>

<mosaic_0001>
module attributes {stable_mosaic.version = 11 : i64} {
  func.func @_causal_lm_head_kernel(%arg0: i32, %arg1: i32, %arg2: i32, %arg3: memref<8x32xf32, #tpu.memory_space<vmem>>, %arg4: memref<1x32xf32, #tpu.memory_space<vmem>>, %arg5: memref<1x32xf32, #tpu.memory_space<vmem>>, %arg6: memref<256x32xf32, #tpu.memory_space<vmem>>, %arg7: memref<1x256xf32, #tpu.memory_space<vmem>>, %arg8: memref<8x256xf32, #tpu.memory_space<vmem>>, %arg9: memref<8x32xf32, #tpu.memory_space<vmem>>) attributes {dimension_semantics = [#tpu.dimension_semantics<parallel>, #tpu.dimension_semantics<parallel>, #tpu.dimension_semantics<arbitrary>], iteration_bounds = array<i64: 2, 2, 1>, scalar_prefetch = 0 : i64, scratch_operands = 1 : i64, tpu.core_type = #tpu.core_type<tc>, window_params = [{transform_indices = @transform_0, window_bounds = array<i64: 8, 32>}, {pipeline_mode = #tpu.pipeline_mode<synchronous>, transform_indices = @transform_1, window_bounds = array<i64: 1, 32>}, {pipeline_mode = #tpu.pipeline_mode<synchronous>, transform_indices = @transform_2, window_bounds = array<i64: 1, 32>}, {transform_indices = @transform_3, window_bounds = array<i64: 256, 32>}, {transform_indices = @transform_4, window_bounds = array<i64: 1, 256>}, {transform_indices = @transform_5, window_bounds = array<i64: 8, 256>}]} {
    %c0_i32 = arith.constant 0 : i32
    %0 = arith.cmpi eq, %arg2, %c0_i32 : i32
    %1 = arith.extui %0 : i1 to i32
    %c0_i32_0 = arith.constant 0 : i32
    %2 = arith.cmpi ne, %1, %c0_i32_0 : i32
    scf.if %2 {
      %c0_8 = arith.constant 0 : index
      %c0_9 = arith.constant 0 : index
      %10 = vector.load %arg3[%c0_8, %c0_9] : memref<8x32xf32, #tpu.memory_space<vmem>>, vector<8x32xf32>
      %cst_10 = arith.constant dense<0.000000e+00> : vector<8xf32>
      %11 = vector.multi_reduction <add>, %10, %cst_10 [1] : vector<8x32xf32> to vector<8xf32>
      %12 = vector.shape_cast %11 : vector<8xf32> to vector<8x1xf32>
      %cst_11 = arith.constant 3.200000e+01 : f32
      %13 = vector.broadcast %cst_11 : f32 to vector<8x1xf32>
      %14 = arith.divf %12, %13 : vector<8x1xf32>
      %15 = vector.broadcast %14 : vector<8x1xf32> to vector<8x32xf32>
      %16 = arith.subf %10, %15 : vector<8x32xf32>
      %17 = arith.mulf %16, %16 : vector<8x32xf32>
      %cst_12 = arith.constant dense<0.000000e+00> : vector<8xf32>
      %18 = vector.multi_reduction <add>, %17, %cst_12 [1] : vector<8x32xf32> to vector<8xf32>
      %19 = vector.shape_cast %18 : vector<8xf32> to vector<8x1xf32>
      %cst_13 = arith.constant 3.200000e+01 : f32
      %20 = vector.broadcast %cst_13 : f32 to vector<8x1xf32>
      %21 = arith.divf %19, %20 : vector<8x1xf32>
      %cst_14 = arith.constant 9.99999974E-6 : f32
      %22 = vector.broadcast %cst_14 : f32 to vector<8x1xf32>
      %23 = arith.addf %21, %22 : vector<8x1xf32>
      %24 = math.rsqrt %23 : vector<8x1xf32>
      %25 = vector.broadcast %24 : vector<8x1xf32> to vector<8x32xf32>
      %26 = arith.mulf %16, %25 : vector<8x32xf32>
      %c0_15 = arith.constant 0 : index
      %c0_16 = arith.constant 0 : index
      %27 = vector.load %arg4[%c0_15, %c0_16] : memref<1x32xf32, #tpu.memory_space<vmem>>, vector<1x32xf32>
      %28 = vector.broadcast %27 : vector<1x32xf32> to vector<8x32xf32>
      %29 = arith.mulf %26, %28 : vector<8x32xf32>
      %c0_17 = arith.constant 0 : index
      %c0_18 = arith.constant 0 : index
      %30 = vector.load %arg5[%c0_17, %c0_18] : memref<1x32xf32, #tpu.memory_space<vmem>>, vector<1x32xf32>
      %31 = vector.broadcast %30 : vector<1x32xf32> to vector<8x32xf32>
      %32 = arith.addf %29, %31 : vector<8x32xf32>
      %c0_19 = arith.constant 0 : index
      %c0_20 = arith.constant 0 : index
      %33 = vector.load %arg9[%c0_19, %c0_20] : memref<8x32xf32, #tpu.memory_space<vmem>>, vector<8x32xf32>
      tpu.vector_store %arg9[%c0_19, %c0_20], %32 {strides = array<i32>} : memref<8x32xf32, #tpu.memory_space<vmem>>, vector<8x32xf32>,
    } else {
    }
    %c0 = arith.constant 0 : index
    %c0_1 = arith.constant 0 : index
    %3 = vector.load %arg9[%c0, %c0_1] : memref<8x32xf32, #tpu.memory_space<vmem>>, vector<8x32xf32>
    %c0_2 = arith.constant 0 : index
    %c0_3 = arith.constant 0 : index
    %4 = vector.load %arg6[%c0_2, %c0_3] : memref<256x32xf32, #tpu.memory_space<vmem>>, vector<256x32xf32>
    %cst = arith.constant dense<0.000000e+00> : vector<8x256xf32>
    %5 = tpu.matmul %3, %4, %cst {dimension_numbers = #tpu.dot_dimension_numbers<[1], [1], [0], [0], [0, 0, 1, 0], [], []>} : vector<8x32xf32>, vector<256x32xf32>, vector<8x256xf32> -> vector<8x256xf32>
    %c0_4 = arith.constant 0 : index
    %c0_5 = arith.constant 0 : index
    %6 = vector.load %arg7[%c0_4, %c0_5] : memref<1x256xf32, #tpu.memory_space<vmem>>, vector<1x256xf32>
    %7 = vector.broadcast %6 : vector<1x256xf32> to vector<8x256xf32>
    %8 = arith.addf %5, %7 : vector<8x256xf32>
    %c0_6 = arith.constant 0 : index
    %c0_7 = arith.constant 0 : index
    %9 = vector.load %arg8[%c0_6, %c0_7] : memref<8x256xf32, #tpu.memory_space<vmem>>, vector<8x256xf32>
    tpu.vector_store %arg8[%c0_6, %c0_7], %8 {strides = array<i32>} : memref<8x256xf32, #tpu.memory_space<vmem>>, vector<8x256xf32>,
    return
  }
  func.func @transform_0(%arg0: i32, %arg1: i32, %arg2: i32) -> (i32, i32) {
    %c0_i32 = arith.constant 0 : i32
    %c0_i32_0 = arith.constant 0 : i32
    return %arg0, %c0_i32 : i32, i32
  }
  func.func @transform_1(%arg0: i32, %arg1: i32, %arg2: i32) -> (i32, i32) {
    %c0_i32 = arith.constant 0 : i32
    %c0_i32_0 = arith.constant 0 : i32
    %c0_i32_1 = arith.constant 0 : i32
    return %c0_i32, %c0_i32_0 : i32, i32
  }
  func.func @transform_2(%arg0: i32, %arg1: i32, %arg2: i32) -> (i32, i32) {
    %c0_i32 = arith.constant 0 : i32
    %c0_i32_0 = arith.constant 0 : i32
    %c0_i32_1 = arith.constant 0 : i32
    return %c0_i32, %c0_i32_0 : i32, i32
  }
  func.func @transform_3(%arg0: i32, %arg1: i32, %arg2: i32) -> (i32, i32) {
    %c1_i32 = arith.constant 1 : i32
    %0 = arith.muli %arg1, %c1_i32 : i32
    %1 = arith.addi %0, %arg2 : i32
    %c0_i32 = arith.constant 0 : i32
    %c0_i32_0 = arith.constant 0 : i32
    return %1, %c0_i32 : i32, i32
  }
  func.func @transform_4(%arg0: i32, %arg1: i32, %arg2: i32) -> (i32, i32) {
    %c1_i32 = arith.constant 1 : i32
    %0 = arith.muli %arg1, %c1_i32 : i32
    %1 = arith.addi %0, %arg2 : i32
    %c0_i32 = arith.constant 0 : i32
    %c0_i32_0 = arith.constant 0 : i32
    return %c0_i32, %1 : i32, i32
  }
  func.func @transform_5(%arg0: i32, %arg1: i32, %arg2: i32) -> (i32, i32) {
    %c1_i32 = arith.constant 1 : i32
    %0 = arith.muli %arg1, %c1_i32 : i32
    %1 = arith.addi %0, %arg2 : i32
    %c0_i32 = arith.constant 0 : i32
    return %arg0, %1 : i32, i32
  }
}

</mosaic_0001>

<bundles_post_ra>
// kernel: tpu_custom_call.1
= control target key start
LH: loop header
LB: loop body
LE: loop exit
PB: predicated region body
PF: predicated region fallthrough
CT: control target
= control target key end

     0   :  { %s1945_s0 = inlined_call_operand.hbm [shape: f32[16,32], index: 0, kind: input, shape index: {}]   ;;  %s1946_s1 = inlined_call_operand.hbm [shape: f32[1,32], index: 1, kind: input, shape index: {}]   ;;  %s1947_s2 = inlined_call_operand.hbm [shape: f32[1,32], index: 2, kind: input, shape index: {}]   ;;  %s1948_s3 = inlined_call_operand.hbm [shape: f32[512,32], index: 3, kind: input, shape index: {}]   ;;  %s1949_s4 = inlined_call_operand.hbm [shape: f32[1,512], index: 4, kind: input, shape index: {}]   ;;  %s1950_s5 = inlined_call_operand.hbm [shape: f32[16,512], index: 5, kind: output, shape index: {}]  }
   0x1   :  { %1974 = sst [smem:[#allocation27_spill]] %s1946_s1 }
   0x2   :  { %1975 = sst [smem:[#allocation28_spill]] %s1947_s2 }
   0x3   :  { %1976 = sst [smem:[#allocation29_spill]] %s1948_s3 }
   0x4   :  { %1977 = sst [smem:[#allocation30_spill]] %s1950_s5 }
   0x5   :  { %10 = vsyncpa [#allocation4], 0 }
   0x6   :  { %12 = vsyncpa [#allocation4 + $0x1], 0 }
   0x7   :  { %13 = vsyncpa [#allocation7], 0 }
   0x8   :  { %14 = vsyncpa [#allocation10], 0 }
   0x9   :  { %16 = vsyncpa [#allocation10 + $0x1], 0 }
   0xa   :  { %17 = vsyncpa [#allocation5], 0 }
   0xb   :  { %19 = vsyncpa [#allocation5 + $0x1], 0  ;;  %s1447_s18 = smov 0   ;;  %s1449_s19 = smov 0  }
   0xc   :  { %s1451_s20 = smov 0   ;;  %s1453_s21 = smov 0  }
   0xd   :  { %s1455_s22 = smov 0   ;;  %s1457_s23 = smov 0  }
   0xe   :  { %s1459_s24 = smov 0   ;;  %s1461_s25 = smov 0  }
   0xf   :  { %s1463_s26 = smov 0   ;;  %s1465_s27 = smov 0  }
  0x10   :  { %s1467_s28 = smov 0   ;;  %s1469_s29 = smov 0  }
  0x11   :  { %s1471_s30 = smov 0   ;;  %s1473_s6 = smov 0  }
  0x12 LB: > { %1978 = sst [smem:[#allocation17_spill]] %s1355_s18  ;;  %s1516_s7 = sadd.s32 4294967295, %s1407_s6   ;;  %s1407_s6 = sphi %s1473_s6, %s25_s6   ;;  %s1403_s30 = sphi %s1471_s30, %s2044_s30   ;;  %s1399_s29 = sphi %s1469_s29, %s2043_s29   ;;  %s1395_s28 = sphi %s1467_s28, %s2042_s28   ;;  %s1391_s27 = sphi %s1465_s27, %s2041_s27   ;;  %s1387_s26 = sphi %s1463_s26, %s2040_s26   ;;  %s1383_s25 = sphi %s1461_s25, %s2039_s25   ;;  %s1379_s24 = sphi %s1459_s24, %s2038_s24   ;;  %s1375_s23 = sphi %s1457_s23, %s2037_s23   ;;  %s1371_s22 = sphi %s1455_s22, %s2036_s22   ;;  %s1367_s21 = sphi %s1453_s21, %s2031_s21   ;;  %s1363_s20 = sphi %s1451_s20, %s2035_s20   ;;  %s1359_s19 = sphi %s1449_s19, %s2034_s19   ;;  %s1355_s18 = sphi %s1447_s18, %s2030_s18  }
  0x13   : > { %1979 = sst [smem:[#allocation18_spill]] %s1359_s19  ;;  %s801_s8 = sadd.s32 4294967294, %s1407_s6  }
  0x14   : > { %1980 = sst [smem:[#allocation19_spill]] %s1371_s22  ;;  %p1954_p0 = scmp.eq.s32.totalorder %s1516_s7, 0 }
  0x15   : > { %1981 = sst [smem:[#allocation20_spill]] %s1391_s27  ;;  %p134_p1 = scmp.ne.s32.totalorder %s1371_s22, %s1367_s21 }
  0x16   : > { %1982 = sst [smem:[#allocation21_spill]] %s1395_s28  ;;  %p189_p2 = scmp.ne.s32.totalorder %s1363_s20, %s1359_s19 }
  0x17   : > { %p190_p3 = scmp.eq.s32.totalorder %s1516_s7, 3  ;;  %p1526_p4 = por %p134_p1, %p1954_p0 }
  0x18   : > { %p195_p5 = scmp.ne.s32.totalorder %s1359_s19, %s1355_s18  ;;  %p196_p7 = scmp.eq.s32.totalorder %s801_s8, 3 }
  0x19   : > { %s1983_s9 = scalar_select %p1526_p4, 1, 0 }
  0x1a   : > { %p1532_p6 = por %p190_p3, %p189_p2  ;;  %p802_p8 = scmp.ge.s32.totalorder %s1407_s6, 1 }
  0x1b   : > { %1984 = sst [smem:[#allocation22_spill]] %s1983_s9  ;;  %p203_p9 = scmp.lt.s32.totalorder %s1407_s6, 5 }
  0x1c   : > { %s1985_s10 = scalar_select %p1532_p6, 1, 0 }
  0x1d   : > { %p1538_p10 = por %p196_p7, %p195_p5  ;;  %p1542_p11 = pnand %p802_p8, %p203_p9 }
  0x1e   : > { %1986 = sst [smem:[#allocation23_spill]] %s1985_s10  ;;  %s1409_s13 = smov [#allocation6]  }
  0x1f   : > { %s1987_s11 = scalar_select %p1538_p10, 1, 0 }
  0x20   : > { %s1989_s12 = scalar_select %p1542_p11, 1, 0 }
  0x21   : > { %1988 = sst [smem:[#allocation24_spill]] %s1987_s11  ;;  %s216_s14 = sshll.u32 %s1409_s13, 4  ;;  %s217_s14 = int_to_ptr.vmem [resolvable:$true] %s216_s14 }
  0x22   : > { %p962_p12 = pneg %p1542_p11  ;;  %s1991_s1 = sld [smem:[#allocation27_spill]] }
  0x24   : > { %p1550_p13 = pnand %p962_p12, %p1954_p0 }
  0x26   : > { %p1962_p3 = pneg %p1550_p13 }
  0x28   : > { %s1107_s8 = scalar_lea.hbm %s1991_s1, 16 }
  0x29   : > { %p1108_p2 = scmp.ne.s32.totalorder %s1991_s1, %s1107_s8  ;;  %p1114_p8 = scmp.lt.u32.totalorder %s1107_s8, %s1991_s1 }
  0x2b   : > { %p1110_p5 = pnand %p1962_p3, %p1108_p2 }
  0x2d   : > { %p1111_p7 = pneg %p1110_p5 }
  0x2f   : > { %p1116_p9 = pnand %p1114_p8, %p1111_p7 }
  0x31   : > { %1119 = shalt.err (!%p1116_p9)
}
  0x32   : > { %s1120_s16 = scalar_lea.vmem %s217_s14, 16  ;;  %s1127_s18 = scalar_lea.vmem %s217_s14, 32 }
  0x33   : > { %p1121_p12 = scmp.ne.s32.totalorder %s217_s14, %s1120_s16  ;;  %p1128_p10 = scmp.lt.s32.totalorder %s217_s14, %s217_s14 }
  0x34   : > { %p1129_p6 = scmp.lt.s32.totalorder %s1127_s18, %s1120_s16 }
  0x35   : > { %p1123_p0 = pnand %p1121_p12, %p1962_p3 }
  0x36   : > { %p1130_p4 = por %p1129_p6, %p1128_p10 }
  0x37   : > { %p1124_p1 = pneg %p1123_p0 }
  0x39   : > { %p1131_p11 = pnand %p1130_p4, %p1124_p1 }
  0x3b   : > { %1134 = shalt.err (!%p1131_p11)
}
  0x3c   : > { %965 = dma.hbm_to_vmem [thread:$0]  (!%p1550_p13), %s1991_s1, 16, %s217_s14, [#allocation7]  }
  0x3d   : > { %p128_p0 = scmp.ne.s32.totalorder %s1375_s23, %s1371_s22  ;;  %p1961_p2 = scmp.lt.s32.totalorder %s1407_s6, 4 }
  0x3e   : > { %s256_s16 = sand.u32 1, %s1407_s6   ;;  %s1958_s17 = sand.u32 1, %s1375_s23  }
  0x3f   : > { %p1992_p4 = scmp.eq.s32.totalorder %s1407_s6, 0  ;;  %s808_s21 = sshll.u32 %s1958_s17, 8 }
  0x40   : > { %s862_s8 = sshll.u32 %s1399_s29, 12  ;;  %s1993_s3 = sld [smem:[#allocation29_spill]] }
  0x41   : > { %p130_p6 = por %p128_p0, %p1992_p4  ;;  %s260_s5 = scalar_lea.vmem [#allocation9], %s808_s21 }
  0x42   : > { %s268_s14 = sshll.u32 %s260_s5, 4  ;;  %s1601_s17 = scalar_lea.sflag [#allocation10], %s256_s16  ;;  %s1599_s14 = int_to_ptr.vmem [resolvable:$true] %s268_s14 }
  0x43   : > { %p1595_p10 = pnand %p1961_p2, %p130_p6 }
  0x45   : > { %s1994_s1 = scalar_select %p1595_p10, 1, 0 }
  0x46   : > { %s1591_s11 = scalar_lea.hbm %s1993_s3, %s862_s8  ;;  %p1964_p1 = pneg %p1595_p10 }
  0x47   : > { %s1135_s13 = scalar_lea.hbm %s1591_s11, 4096  ;;  %s1140_s18 = scalar_lea.hbm %s1993_s3, 8192 }
  0x48   : > { %p1136_p11 = scmp.ne.s32.totalorder %s1591_s11, %s1135_s13  ;;  %p1141_p8 = scmp.lt.u32.totalorder %s1591_s11, %s1993_s3 }
  0x49   : > { %p1142_p9 = scmp.lt.u32.totalorder %s1140_s18, %s1135_s13  ;;  %p1144_p0 = scmp.lt.u32.totalorder %s1135_s13, %s1591_s11 }
  0x4a   : > { %p1138_p5 = pnand %p1964_p1, %p1136_p11 }
  0x4b   : > { %p1143_p12 = por %p1142_p9, %p1141_p8 }
  0x4c   : > { %p1139_p7 = pneg %p1138_p5 }
  0x4d   : > { %p1145_p4 = por %p1144_p0, %p1143_p12 }
  0x4f   : > { %p1146_p6 = pnand %p1145_p4, %p1139_p7 }
  0x51   : > { %1149 = shalt.err (!%p1146_p6)
}
  0x52   : > { %s1150_s16 = scalar_lea.vmem %s1599_s14, 4096  ;;  %s1410_s21 = smov [#allocation9]  }
  0x53   : > { %p1151_p11 = scmp.ne.s32.totalorder %s1599_s14, %s1150_s16  ;;  %s1155_s8 = sshll.u32 %s1410_s21, 4  ;;  %s1156_s8 = int_to_ptr.vmem [resolvable:$false] %s1155_s8 }
  0x54   : > { %s1157_s10 = scalar_lea.vmem %s1156_s8, 8192  ;;  %p1158_p3 = scmp.lt.s32.totalorder %s1599_s14, %s1156_s8 }
  0x55   : > { %p1153_p5 = pnand %p1151_p11, %p1964_p1  ;;  %p1159_p8 = scmp.lt.s32.totalorder %s1157_s10, %s1150_s16 }
  0x57   : > { %p1154_p2 = pneg %p1153_p5  ;;  %p1160_p9 = por %p1159_p8, %p1158_p3 }
  0x59   : > { %p1161_p12 = pnand %p1160_p9, %p1154_p2 }
  0x5b   : > { %1164 = shalt.err (!%p1161_p12)
}
  0x5c   : > { %s1411_s13 = smov 128   ;;  %s1412_s18 = smov 8  }
  0x5d   : > { %975 = dma.hbm_to_vmem [thread:$0]  (!%p1595_p10), %s1591_s11, 4096, %s1599_s14, %s1601_s17, %s1411_s13, %s1411_s13, %s1412_s18  }
  0x5e   : > { %s1413_s5 = smov [#allocation8]   ;;  %s1995_s2 = sld [smem:[#allocation28_spill]] }
  0x5f   : > { %s227_s3 = sshll.u32 %s1413_s5, 4  ;;  %p1996_p2 = pneg %p1550_p13  ;;  %s228_s3 = int_to_ptr.vmem [resolvable:$true] %s227_s3 }
  0x64   : > { %s1165_s8 = scalar_lea.hbm %s1995_s2, 16 }
  0x65   : > { %p1166_p3 = scmp.ne.s32.totalorder %s1995_s2, %s1165_s8  ;;  %p1172_p4 = scmp.lt.u32.totalorder %s1165_s8, %s1995_s2 }
  0x67   : > { %p1168_p7 = pnand %p1166_p3, %p1996_p2 }
  0x69   : > { %p1169_p0 = pneg %p1168_p7 }
  0x6b   : > { %p1174_p6 = pnand %p1172_p4, %p1169_p0 }
  0x6d   : > { %1177 = shalt.err (!%p1174_p6)
}
  0x6e   : > { %s1178_s11 = scalar_lea.vmem %s228_s3, 16  ;;  %p1997_p5 = pmov %p1996_p2 }
  0x6f   : > { %p1179_p11 = scmp.ne.s32.totalorder %s228_s3, %s1178_s11  ;;  %s1185_s28 = scalar_lea.vmem %s228_s3, 32 }
  0x70   : > { %p1186_p12 = scmp.lt.s32.totalorder %s228_s3, %s228_s3  ;;  %p1187_p1 = scmp.lt.s32.totalorder %s1185_s28, %s1178_s11 }
  0x71   : > { %p1181_p8 = pnand %p1179_p11, %p1997_p5 }
  0x72   : > { %p1188_p10 = por %p1187_p1, %p1186_p12 }
  0x73   : > { %p1182_p9 = pneg %p1181_p8 }
  0x75   : > { %p1189_p2 = pnand %p1188_p10, %p1182_p9 }
  0x77   : > { %1192 = shalt.err (!%p1189_p2)
}
  0x78   : > { %968 = dma.hbm_to_vmem [thread:$0]  (!%p1550_p13), %s1995_s2, 16, %s228_s3, [#allocation7]  }
  0x79   : > { %s40_s27 = sadd.s32 1, %s1399_s29  ;;  %s44_s15 = sadd.s32 1, %s1403_s30 }
  0x7a   : > { %p42_p10 = scmp.ge.s32.totalorder %s40_s27, 2  ;;  %s51_s13 = sadd.s32 1, %s1387_s26 }
  0x7b   : > { %p58_p1 = scmp.ne.s32.totalorder %s1387_s26, %s1383_s25  ;;  %p1999_p3 = scmp.eq.s32.totalorder %s1407_s6, 0 }
  0x7c   : > { %s2046_s27 = smov (%p42_p10, %s40_s27), 0  ;;  %s2048_s15 = smov (!%p42_p10, %s44_s15), %s1403_s30 }
  0x7d   : > { %1998 = sst [smem:[#allocation25_spill]] %s2046_s27  ;;  %p1659_p7 = por %p1999_p3, %p58_p1 }
  0x7e   : > { %p64_p13 = scmp.ne.s32.totalorder %s1383_s25, %s1379_s24  ;;  %p46_p0 = scmp.ge.s32.totalorder %s2048_s15, 2 }
  0x7f   : > { %s118_s3 = ssub.s32 %s1399_s29, %s2046_s27  ;;  %p2001_p4 = scmp.eq.s32.totalorder %s1516_s7, 0 }
  0x80   : > { %p119_p11 = scmp.eq.s32.totalorder %s118_s3, 0  ;;  %s2050_s15 = smov (%p46_p0, %s2048_s15), 0 }
  0x81   : > { %p1669_p6 = por %p2001_p4, %p64_p13  ;;  %2003 = sst [smem:[#allocation26_spill]] %s2050_s15 }
  0x82   : > { %s2004_s21 = sadd.s32 1, %s1375_s23  ;;  %s48_s16 = ssub.s32 %s1403_s30, %s2050_s15 }
  0x83   : > { %s2002_s5 = scalar_select %p1669_p6, 1, 0 }
  0x84   : > { %s1678_s8 = scalar_select %p119_p11, %s1375_s23, %s2004_s21  }
  0x85   : > { %s179_s24 = sadd.s32 1, %s1363_s20  ;;  %p49_p5 = scmp.eq.s32.totalorder %s48_s16, 0 }
  0x86   : > { %s176_s10 = sor.u32 %s118_s3, %s48_s16  ;;  %s238_s11 = sand.u32 1, %s1387_s26  }
  0x87   : > { %p177_p8 = scmp.eq.s32.totalorder %s176_s10, 0  ;;  %s806_s19 = sshll.u32 %s238_s11, 3 }
  0x88   : > { %s1685_s28 = scalar_select %p49_p5, %s1387_s26, %s51_s13  }
  0x89   : > { %s1688_s14 = scalar_select %p177_p8, %s1363_s20, %s179_s24  }
  0x8a   : > { %s807_s2 = sshll.u32 %s1403_s30, 7  ;;  %s242_s21 = scalar_lea.vmem [#allocation3], %s806_s19 }
  0x8b   : > { %s1694_s22 = scalar_lea.hbm %s1945_s0, %s807_s2  ;;  %s249_s15 = sshll.u32 %s242_s21, 4  ;;  %s1696_s15 = int_to_ptr.vmem [resolvable:$true] %s249_s15 }
  0x8c   : > { %p2005_p9 = scmp.lt.s32.totalorder %s1407_s6, 4  ;;  %s2007_s3 = sand.u32 1, %s1375_s23  }
  0x8d   : > { %s1708_s9 = sshll.u32 %s2007_s3, 1  ;;  %s863_s2 = sshll.u32 %s1399_s29, 5 }
  0x8e   : > { %p1702_p12 = pnand %p2005_p9, %p1659_p7  ;;  %s239_s27 = scalar_lea.sflag [#allocation4], %s238_s11 }
  0x8f   : > { %s1193_s16 = scalar_lea.hbm %s1694_s22, 128  ;;  %s1198_s10 = scalar_lea.hbm %s1945_s0, 256 }
  0x90   : > { %p1194_p2 = scmp.ne.s32.totalorder %s1694_s22, %s1193_s16  ;;  %p1195_p10 = pneg %p1702_p12 }
  0x91   : > { %p1199_p7 = scmp.lt.u32.totalorder %s1694_s22, %s1945_s0  ;;  %p1200_p13 = scmp.lt.u32.totalorder %s1198_s10, %s1193_s16 }
  0x92   : > { %p1196_p1 = pnand %p1195_p10, %p1194_p2  ;;  %p1202_p4 = scmp.lt.u32.totalorder %s1193_s16, %s1694_s22 }
  0x93   : > { %p1201_p0 = por %p1200_p13, %p1199_p7 }
  0x94   : > { %p1197_p3 = pneg %p1196_p1 }
  0x95   : > { %p1203_p11 = por %p1202_p4, %p1201_p0 }
  0x97   : > { %p1204_p5 = pnand %p1203_p11, %p1197_p3 }
  0x99   : > { %1207 = shalt.err (!%p1204_p5)
}
  0x9a   : > { %s1208_s11 = scalar_lea.vmem %s1696_s15, 128  ;;  %s1414_s3 = smov [#allocation3]  }
  0x9b   : > { %p1209_p8 = scmp.ne.s32.totalorder %s1696_s15, %s1208_s11  ;;  %s1213_s18 = sshll.u32 %s1414_s3, 4  ;;  %s1214_s18 = int_to_ptr.vmem [resolvable:$false] %s1213_s18 }
  0x9c   : > { %s1215_s24 = scalar_lea.vmem %s1214_s18, 256  ;;  %p1216_p1 = scmp.lt.s32.totalorder %s1696_s15, %s1214_s18 }
  0x9d   : > { %p1211_p9 = pnand %p1209_p8, %p1195_p10  ;;  %p1217_p7 = scmp.lt.s32.totalorder %s1215_s24, %s1208_s11 }
  0x9f   : > { %p1212_p2 = pneg %p1211_p9  ;;  %p1218_p13 = por %p1217_p7, %p1216_p1 }
  0xa1   : > { %p1219_p0 = pnand %p1218_p13, %p1212_p2 }
  0xa3   : > { %1222 = shalt.err (!%p1219_p0)
}
  0xa4   : > { %972 = dma.hbm_to_vmem [thread:$0]  (!%p1702_p12), %s1694_s22, 128, %s1696_s15, %s239_s27  }
  0xa5   : > { %s1741_s19 = scalar_lea.hbm %s1949_s4, %s863_s2  ;;  %s282_s21 = scalar_lea.vmem [#allocation11], %s1708_s9 }
  0xa6   : > { %s291_s11 = sshll.u32 %s282_s21, 4  ;;  %s1223_s13 = scalar_lea.hbm %s1741_s19, 32  ;;  %s292_s11 = int_to_ptr.vmem [resolvable:$true] %s291_s11 }
  0xa7   : > { %p1224_p10 = scmp.ne.s32.totalorder %s1741_s19, %s1223_s13  ;;  %p2008_p3 = scmp.ne.s32.totalorder %s1994_s1, 0 }
  0xa8   : > { %s1228_s27 = scalar_lea.hbm %s1949_s4, 64  ;;  %p1229_p12 = scmp.lt.u32.totalorder %s1741_s19, %s1949_s4 }
  0xa9   : > { %p2009_p4 = pneg %p2008_p3  ;;  %p1230_p8 = scmp.lt.u32.totalorder %s1228_s27, %s1223_s13 }
  0xaa   : > { %p1232_p2 = scmp.lt.u32.totalorder %s1223_s13, %s1741_s19 }
  0xab   : > { %p1226_p11 = pnand %p1224_p10, %p2009_p4  ;;  %p1231_p9 = por %p1230_p8, %p1229_p12 }
  0xad   : > { %p1227_p5 = pneg %p1226_p11  ;;  %p1233_p1 = por %p1232_p2, %p1231_p9 }
  0xaf   : > { %p1234_p7 = pnand %p1233_p1, %p1227_p5 }
  0xb1   : > { %1237 = shalt.err (!%p1234_p7)
}
  0xb2   : > { %s1238_s9 = scalar_lea.vmem %s292_s11, 32  ;;  %p2010_p0 = pmov %p2009_p4 }
  0xb3   : > { %p1239_p13 = scmp.ne.s32.totalorder %s292_s11, %s1238_s9  ;;  %s1415_s18 = smov [#allocation11]  }
  0xb4   : > { %s1243_s24 = sshll.u32 %s1415_s18, 4  ;;  %s1244_s24 = int_to_ptr.vmem [resolvable:$false] %s1243_s24 }
  0xb5   : > { %p1241_p10 = pnand %p1239_p13, %p2010_p0  ;;  %s1245_s16 = scalar_lea.vmem %s1244_s24, 64 }
  0xb6   : > { %p1246_p11 = scmp.lt.s32.totalorder %s292_s11, %s1244_s24  ;;  %p1247_p6 = scmp.lt.s32.totalorder %s1245_s16, %s1238_s9 }
  0xb7   : > { %p1242_p4 = pneg %p1241_p10 }
  0xb8   : > { %p1248_p8 = por %p1247_p6, %p1246_p11 }
  0xba   : > { %p1249_p12 = pnand %p1248_p8, %p1242_p4 }
  0xbc   : > { %1252 = shalt.err (!%p1249_p12)
}
  0xbd   : > { %978 = dma.hbm_to_vmem [thread:$0]  (!%p2008_p3), %s1741_s19, 32, %s292_s11, %s1601_s17  }
  0xbe   : > { %p2011_p5 = scmp.ne.s32.totalorder %s1989_s12, 0 }
  0xbf   : > { %s302_s10 = sand.u32 (!%p2011_p5), 1, %s1383_s25   ;;  %p2012_p9 = scmp.ne.s32.totalorder (!%p2011_p5), %s2002_s5, 0 }
  0xc0   : > { %300 = sbr.rel (%p2011_p5) target bundleno = 765 (0x2fd), region = 40  ;;  %s815_s21 = sshll.u32 (!%p2011_p5), %s302_s10, 3 }
  0xc1   : > { %s303_s13 = scalar_lea.sflag (!%p2011_p5), [#allocation4], %s302_s10  ;;  %s306_s22 = scalar_lea.vmem (!%p2011_p5), [#allocation3], %s815_s21 }
  0xc7   : > { %1338 = dma.done.wait (%p2012_p9), %s303_s13, 128  }
  0xc8   : > { %1340 = vsyncadd (%p2012_p9), %s303_s13, 4294967168  ;;  %p2013_p6 = scmp.eq.s32.totalorder %s1516_s7, 0 }
  0xca   : > { %1342 = dma.done.wait (%p2013_p6), [#allocation7], 32   ;;  %p2014_p2 = pmov %p2013_p6 }
  0xcb   : > { %s2015_s1 = sld [smem:[#allocation19_spill]]  ;;  %s2016_s12 = sld [smem:[#allocation22_spill]] }
  0xcc   : > { %1344 = vsyncadd (%p2014_p2), [#allocation7], 4294967264  ;;  %s319_s17 = sand.u32 1, %s1516_s7  }
  0xcd   : > { %s320_s15 = scalar_lea.sflag [#allocation10], %s319_s17 }
  0xd1   : > { %s321_s19 = sand.u32 1, %s2015_s1   ;;  %p2017_p3 = scmp.ne.s32.totalorder %s2016_s12, 0 }
  0xd2   : > { %s818_s11 = sshll.u32 %s321_s19, 8 }
  0xd3   : > { %s1779_s27 = scalar_lea.vmem [#allocation9], %s818_s11 }
  0xd4   : > { %1346 = dma.done.wait (%p2017_p3), %s320_s15, 4128  }
  0xd5   : > { %1348 = vsyncadd (%p2017_p3), %s320_s15, 4294963168  ;;  %vm380_vm0 = vcmask 261120   ;;  %v379_v0 = vld [vmem:[%s306_s22] sm:$0xff]  ;;  %v429_v3 = vld [vmem:[%s1779_s27 + $0x80] sm:$0xff]  ;;  %s2020_s7 = sld [smem:[#allocation18_spill]]  ;;  %s2021_s5 = sld [smem:[#allocation20_spill]]  ;;  %v447_v2 = vlaneseq }
  0xd6   : > { %v381_v1 = vsel %vm380_vm0, %v379_v0, 0.0  ;;  %vm1788_vm1 = vmpackc.low %vm380_vm0, %vm380_vm0  ;;  %v430_v4 = vld [vmem:[%s1779_s27 + $0x88] sm:$0xff]  ;;  %v413_v5 = vld [vmem:[%s1779_s27] sm:$0xff]  ;;  %s2022_s3 = sld [smem:[#allocation21_spill]]  ;;  %s819_s2 = sshll.u32 %s321_s19, 1 }
  0xd7   : > { %382 = vadd.xlane.f32.xlu0 %v381_v1  ;;  %v898_v6 = vpack.c.bf16 %v430_v4, %v429_v3  ;;  %v414_v7 = vld [vmem:[%s1779_s27 + $0x8] sm:$0xff]  ;;  %v431_v8 = vld [vmem:[%s1779_s27 + $0x90] sm:$0xff]  ;;  %v432_v9 = vld [vmem:[%s1779_s27 + $0x98] sm:$0xff]  ;;  %v448_v3 = vshrl.u32 %v447_v2, 7  ;;  %s332_s10 = scalar_lea.vmem [#allocation11], %s819_s2  ;;  %s2023_s13 = sld [smem:[#allocation23_spill]] }
  0xd8   : > { %v901_v10 = vpack.c.bf16 %v414_v7, %v413_v5  ;;  %v904_v11 = vpack.c.bf16 %v432_v9, %v431_v8  ;;  %v415_v12 = vld [vmem:[%s1779_s27 + $0x10] sm:$0xff]  ;;  %v416_v13 = vld [vmem:[%s1779_s27 + $0x18] sm:$0xff]  ;;  %v433_v14 = vld [vmem:[%s1779_s27 + $0xa0] sm:$0xff]  ;;  %s2024_s11 = sld [smem:[#allocation30_spill]] }
  0xd9   : > { %900 = vmatprep.subr.msk.bf16.mxu0 %vm1788_vm1, %v898_v6  ;;  %v434_v15 = vld [vmem:[%s1779_s27 + $0xa8] sm:$0xff]  ;;  %v907_v16 = vpack.c.bf16 %v416_v13, %v415_v12  ;;  %v417_v18 = vld [vmem:[%s1779_s27 + $0x20] sm:$0xff]  ;;  %v435_v20 = vld [vmem:[%s1779_s27 + $0xb0] sm:$0xff]  ;;  %v449_v4 = vsub.s32 0, %v448_v3  ;;  %v453_v6 = vsub.s32 1, %v448_v3 }
  0xda   : > { %903 = vmatpush3.bf16.xpose.msk.msra.mxu0 %vm1788_vm1, %v901_v10  ;;  %v910_v17 = vpack.c.bf16 %v434_v15, %v433_v14  ;;  %v418_v19 = vld [vmem:[%s1779_s27 + $0x28] sm:$0xff]  ;;  %v436_v21 = vld [vmem:[%s1779_s27 + $0xb8] sm:$0xff]  ;;  %v419_v24 = vld [vmem:[%s1779_s27 + $0x30] sm:$0xff] }
  0xdb   : > { %906 = vmatprep.subr.msk.bf16.mxu0 %vm1788_vm1, %v904_v11  ;;  %v913_v22 = vpack.c.bf16 %v418_v19, %v417_v18  ;;  %v916_v23 = vpack.c.bf16 %v436_v21, %v435_v20  ;;  %v420_v25 = vld [vmem:[%s1779_s27 + $0x38] sm:$0xff]  ;;  %v437_v26 = vld [vmem:[%s1779_s27 + $0xc0] sm:$0xff]  ;;  %v438_v27 = vld [vmem:[%s1779_s27 + $0xc8] sm:$0xff]  ;;  %s366_s9 = sand.u32 1, %s2020_s7   ;;  %s857_s24 = sshll.u32 %s2021_s5, 1 }
  0xdc   : > { %v919_v28 = vpack.c.bf16 %v420_v25, %v419_v24  ;;  %v922_v29 = vpack.c.bf16 %v438_v27, %v437_v26  ;;  %v421_v30 = vld [vmem:[%s1779_s27 + $0x40] sm:$0xff]  ;;  %v422_v31 = vld [vmem:[%s1779_s27 + $0x48] sm:$0xff]  ;;  %v439_v38 = vld [vmem:[%s1779_s27 + $0xd0] sm:$0xff]  ;;  %s820_s18 = sshll.u32 %s366_s9, 4  ;;  %s858_s16 = sshll.u32 %s2022_s3, 2 }
  0xdd   : > { %v925_v32 = vpack.c.bf16 %v422_v31, %v421_v30  ;;  %v440_v39 = vld [vmem:[%s1779_s27 + $0xd8] sm:$0xff]  ;;  %v423_v41 = vld [vmem:[%s1779_s27 + $0x50] sm:$0xff]  ;;  %v441_v44 = vld [vmem:[%s1779_s27 + $0xe0] sm:$0xff]  ;;  %s644_s21 = sadd.s32 %s858_s16, %s857_s24  ;;  %s368_s12 = scalar_lea.vmem [#allocation12], %s820_s18 }
  0xde   : > { %v928_v40 = vpack.c.bf16 %v440_v39, %v439_v38  ;;  %v424_v42 = vld [vmem:[%s1779_s27 + $0x58] sm:$0xff]  ;;  %v442_v45 = vld [vmem:[%s1779_s27 + $0xe8] sm:$0xff]  ;;  %v425_v47 = vld [vmem:[%s1779_s27 + $0x60] sm:$0xff]  ;;  %s859_s22 = sshll.u32 %s644_s21, 7  ;;  %s648_s17 = sshll.u32 %s368_s12, 4  ;;  %s1870_s17 = int_to_ptr.vmem [resolvable:$true] %s648_s17 }
  0xdf   : > { %v931_v43 = vpack.c.bf16 %v424_v42, %v423_v41  ;;  %v934_v46 = vpack.c.bf16 %v442_v45, %v441_v44  ;;  %v426_v48 = vld [vmem:[%s1779_s27 + $0x68] sm:$0xff]  ;;  %v443_v50 = vld [vmem:[%s1779_s27 + $0xf0] sm:$0xff]  ;;  %v444_v51 = vld [vmem:[%s1779_s27 + $0xf8] sm:$0xff]  ;;  %s1868_s15 = scalar_lea.hbm %s2024_s11, %s859_s22  ;;  %s1253_s7 = scalar_lea.vmem %s1870_s17, 256 }
  0xe0   : > { %v937_v49 = vpack.c.bf16 %v426_v48, %v425_v47  ;;  %v940_v52 = vpack.c.bf16 %v444_v51, %v443_v50  ;;  %v427_v53 = vld [vmem:[%s1779_s27 + $0x70] sm:$0xff]  ;;  %v428_v54 = vld [vmem:[%s1779_s27 + $0x78] sm:$0xff]  ;;  %v445_v5 = vld [vmem:[%s332_s10] sm:$0x3]  ;;  %s631_s27 = scalar_lea.sflag [#allocation5], %s366_s9  ;;  %p1254_p1 = scmp.ne.s32.totalorder %s1870_s17, %s1253_s7 }
  0xe1   : > { %v943_v55 = vpack.c.bf16 %v428_v54, %v427_v53  ;;  %v821_v60 = vld [vmem:[#allocation6] ss:$0 sm:$0xff]  ;;  %v822_v62 = vld [vmem:[#allocation8] ss:$0 sm:$0xff]  ;;  %v450_v7 = vrot.slane %v445_v5, %v449_v4  ;;  %v454_v8 = vrot.slane %v445_v5, %v453_v6  ;;  %p2025_p7 = scmp.ne.s32.totalorder %s2023_s13, 0  ;;  %s1416_s5 = smov [#allocation12]  }
  0xe2   : > { %909 = vmatpush3.bf16.xpose.msk.msra.mxu0 %vm1788_vm1, %v907_v16  ;;  %s1257_s3 = sshll.u32 %s1416_s5, 4  ;;  %s1258_s3 = int_to_ptr.vmem [resolvable:$false] %s1257_s3 }
  0xe3   : > { %912 = vmatprep.subr.msk.bf16.mxu0 %vm1788_vm1, %v910_v17  ;;  %p1255_p13 = pnand %p1254_p1, %p2025_p7  ;;  %s1259_s2 = scalar_lea.vmem %s1258_s3, 512 }
  0xe4   : > { %p1260_p10 = scmp.lt.s32.totalorder %s1870_s17, %s1258_s3  ;;  %p1261_p4 = scmp.lt.s32.totalorder %s1259_s2, %s1253_s7 }
  0xe5   : > { %p1256_p0 = pneg %p1255_p13 }
  0xe6   : > { %p1262_p11 = por %p1261_p4, %p1260_p10 }
  0xe8   : > { %p1263_p8 = pnand %p1262_p11, %p1256_p0 }
  0xea   : > { %915 = vmatpush3.bf16.xpose.msk.msra.mxu0 %vm1788_vm1, %v913_v22 }
  0xeb   : > { %918 = vmatprep.subr.msk.bf16.mxu0 %vm1788_vm1, %v916_v23 }
  0xf2   : > { %921 = vmatpush3.bf16.xpose.msk.msra.mxu0 %vm1788_vm1, %v919_v28 }
  0xf3   : > { %924 = vmatprep.subr.msk.bf16.mxu0 %vm1788_vm1, %v922_v29 }
  0xfa   : > { %927 = vmatpush3.bf16.xpose.msk.msra.mxu0 %vm1788_vm1, %v925_v32 }
  0xfb   : > { %930 = vmatprep.subr.msk.bf16.mxu0 %vm1788_vm1, %v928_v40 }
 0x102   : > { %933 = vmatpush3.bf16.xpose.msk.msra.mxu0 %vm1788_vm1, %v931_v43 }
 0x103   : > { %936 = vmatprep.subr.msk.bf16.mxu0 %vm1788_vm1, %v934_v46 }
 0x10a   : > { %939 = vmatpush3.bf16.xpose.msk.msra.mxu0 %vm1788_vm1, %v937_v49 }
 0x10b   : > { %942 = vmatprep.subr.msk.bf16.mxu0 %vm1788_vm1, %v940_v52 }
 0x112   : > { %945 = vmatpush3.bf16.xpose.msk.msra.mxu0 %vm1788_vm1, %v943_v55 }
 0x164   : > { %v383_v33 = vpop.xlane.xlu0 %382 }
 0x165   : > { %v385_v34 = vmul.f32 0.03125, %v383_v33 }
 0x167   : > { %v386_v35 = vsub.f32 %v379_v0, %v385_v34 }
 0x169   : > { %v387_v36 = vmul.f32 %v386_v35, %v386_v35 }
 0x16b   : > { %v388_v37 = vsel %vm380_vm0, %v387_v36, 0.0 }
 0x16c   : > { %389 = vadd.xlane.f32.xlu0 %v388_v37 }
 0x1f9   : > { %v390_v56 = vpop.xlane.xlu0 %389 }
 0x1fa   : > { %v391_v57 = vmul.f32 0.03125, %v390_v56 }
 0x1fc   : > { %v392_v58 = vadd.f32 1e-05, %v391_v57 }
 0x1fe   : > { %1105 = vrsqrt.f32 %v392_v58 }
 0x208   : > { %v1106_v59 = vpop.eup %1105 }
 0x209   : > { %v394_v61 = vmul.f32 %v1106_v59, %v386_v35 }
 0x20b   : > { %v402_v63 = vmul.f32 %v821_v60, %v394_v61 }
 0x20d   : > { %v410_v0 = vadd.f32 %v822_v62, %v402_v63 }
 0x20f   : > { %411 = vst.msk [vmem:[#allocation2] sm:$0xff] %vm380_vm0, %v410_v0 }
 0x216   : > { %v412_v1 = vld [vmem:[#allocation2] sm:$0xff] }
 0x217   : > { %896 = vmatprep.mubr.msk.f32.mxu0 %vm380_vm0, %v412_v1 }
 0x218   : > { %897 = vmatmul.mubr.msk.f32.vlgmr.msra.gmra.mrb[0].mxu0 %vm380_vm0, %v412_v1 }
 0x2eb   : > { %v623_v9 = vpop.f32.mrb[0].mxu0 }
 0x2ec   : > { %v624_v10 = vadd.f32 %v623_v9, %v450_v7  ;;  %v625_v11 = vpop.f32.mrb[1].mxu0 }
 0x2ed   : > { %v626_v12 = vadd.f32 %v625_v11, %v454_v8 }
 0x2ee   : > { %628 = vst [vmem:[%s368_s12] sm:$0xff] %v624_v10 }
 0x2ef   : > { %629 = vst [vmem:[%s368_s12 + $0x8] sm:$0xff] %v626_v12 }
 0x2f0   : > { %1266 = shalt.err (!%p1263_p8)
}
 0x2f1   : > { %s1267_s9 = scalar_lea.hbm %s1868_s15, 256  ;;  %s1271_s16 = scalar_lea.hbm %s2024_s11, 1024 }
 0x2f2   : > { %p1268_p12 = scmp.ne.s32.totalorder %s1868_s15, %s1267_s9  ;;  %p1272_p6 = scmp.lt.u32.totalorder %s1868_s15, %s2024_s11 }
 0x2f3   : > { %p1273_p2 = scmp.lt.u32.totalorder %s1271_s16, %s1267_s9  ;;  %p1275_p1 = scmp.lt.u32.totalorder %s1267_s9, %s1868_s15 }
 0x2f4   : > { %p1269_p5 = pnand %p1268_p12, %p2025_p7 }
 0x2f5   : > { %p1274_p3 = por %p1273_p2, %p1272_p6 }
 0x2f6   : > { %p1270_p9 = pneg %p1269_p5 }
 0x2f7   : > { %p1276_p13 = por %p1275_p1, %p1274_p3 }
 0x2f9   : > { %p1277_p0 = pnand %p1276_p13, %p1270_p9 }
 0x2fb   : > { %1280 = shalt.err (!%p1277_p0)
}
 0x2fc   : > { %960 = dma.vmem_to_hbm [thread:$0]  (%p2025_p7), %s1870_s17, 256, %s1868_s15, %s631_s27  }
 0x2fd PF: > { %s2026_s22 = sld [smem:[#allocation17_spill]]  ;;  %s2027_s12 = sld [smem:[#allocation24_spill]] }
 0x2fe   : > { %p988_p10 = scmp.ge.s32.totalorder %s1407_s6, 2 }
 0x303   : > { %s660_s1 = sand.u32 1, %s2026_s22   ;;  %p2028_p4 = scmp.ne.s32.totalorder %s2027_s12, 0 }
 0x304   : > { %s661_s19 = scalar_lea.sflag [#allocation5], %s660_s1 }
 0x305   : > { %p980_p11 = pnand %p988_p10, %p2028_p4 }
 0x307   : > { %1350 = dma.done.wait (!%p980_p11), %s661_s19, 256  }
 0x308   : > { %1352 = vsyncadd (!%p980_p11), %s661_s19, 4294967040  ;;  %s25_s6 = sadd.s32 1, %s1407_s6   ;;  %s2030_s18 = sld [smem:[#allocation18_spill]] }
 0x309   : > { %p1898_p8 = scmp.ge.s32.totalorder %s25_s6, 6   ;;  %s2031_s21 = sld [smem:[#allocation19_spill]] }
 0x30a   : > { %s2032_s13 = sld [smem:[#allocation25_spill]]  ;;  %s2033_s17 = sld [smem:[#allocation26_spill]] }
 0x30b   : > { %s2034_s19 = smov %s1363_s20  ;;  %s2035_s20 = smov %s1688_s14 }
 0x30c   : > { %s2036_s22 = smov %s1375_s23  ;;  %s2037_s23 = smov %s1678_s8 }
 0x30d   : > { %s2038_s24 = smov %s1383_s25  ;;  %s2039_s25 = smov %s1387_s26 }
 0x30e   : > { %s2040_s26 = smov %s1685_s28  ;;  %s2041_s27 = smov %s1399_s29 }
 0x30f   : > { %s2042_s28 = smov %s1403_s30  ;;  %24 = sbr.rel (!%p1898_p8) target bundleno = 18 (0x12), region = 121 }
 0x310   : > { %s2043_s29 = smov %s2032_s13  ;;  %s2044_s30 = smov %s2033_s17 }
 0x316   :  { %666 = vsyncpa [#allocation4], 1 }
 0x317   :  { %668 = vsyncpa [#allocation4 + $0x1], 1 }
 0x318   :  { %669 = vsyncpa [#allocation7], 1 }
 0x319   :  { %670 = vsyncpa [#allocation10], 1 }
 0x31a   :  { %672 = vsyncpa [#allocation10 + $0x1], 1 }
 0x31b   :  { %673 = vsyncpa [#allocation5], 1 }
 0x31c   :  { %675 = vsyncpa [#allocation5 + $0x1], 1 }

</bundles_post_ra>
